<compile_context>
chip_gen: v7x
topology: tpu7x:2x2x1
jax: 0.10.0
libtpu: 0.0.40
codegen_flags: <defaults>
</compile_context>

<pallas_src>
import functools

import jax
import jax.numpy as jnp
from jax.experimental import pallas as pl
from jax.experimental.pallas import tpu as pltpu

_LANE = 128


def _dice_kernel(p_ref, t_ref, out_ref, num_acc, den_acc, *,
                 smooth, p_pow, rows_per_block, total_rows, need_mask):
    c = pl.program_id(1)

    @pl.when(c == 0)
    def _():
        num_acc[...] = jnp.zeros_like(num_acc)
        den_acc[...] = jnp.zeros_like(den_acc)

    pr = p_ref[...].astype(jnp.float32)   # (S, 128)
    tg = t_ref[...].astype(jnp.float32)   # (S, 128)

    if need_mask:
        # Ragged tail: rows >= total_rows are out-of-bounds garbage -> zero them.
        row = c * rows_per_block + jax.lax.broadcasted_iota(
            jnp.int32, pr.shape, 0)
        valid = row < total_rows
        pr = jnp.where(valid, pr, 0.0)
        tg = jnp.where(valid, tg, 0.0)

    # Per-lane partial sums (defer the cross-lane XLU reduce to the end).
    num_acc[...] += jnp.sum(pr * tg, axis=0, keepdims=True)

    if p_pow == 1:
        den_part = pr + tg
    elif isinstance(p_pow, int) and 2 <= p_pow <= 4:
        # Repeated multiplies on the VPU instead of jnp.power (EUP exp/log).
        pp, tp = pr, tg
        for _ in range(p_pow - 1):
            pp = pp * pr
            tp = tp * tg
        den_part = pp + tp
    else:
        den_part = jnp.power(pr, p_pow) + jnp.power(tg, p_pow)
    den_acc[...] += jnp.sum(den_part, axis=0, keepdims=True)

    @pl.when(c == pl.num_programs(1) - 1)
    def _():
        num = 2.0 * jnp.sum(num_acc[...]) + smooth
        den = jnp.sum(den_acc[...]) + smooth
        loss = (1.0 - num / den).astype(jnp.float32)
        out_ref[...] = jnp.full(out_ref.shape, loss, dtype=jnp.float32)


def binary_dice_loss(predict, target, *, smooth=1.0, p=2,
                     block_bytes=2 * 1024 * 1024):
    """Pallas implementation of BinaryDiceLoss.forward (returns scalar sum)."""
    assert predict.shape[0] == target.shape[0], \
        "predict & target batch size don't match"
    n = predict.shape[0]
    pred2d = predict.reshape(n, -1)
    targ2d = target.reshape(n, -1)
    m = pred2d.shape[1]

    # Only pad (at most 127 elems/row) when M is not lane-aligned; for typical
    # image tensors (C*H*W % 128 == 0) this is a zero-copy reshape.
    pad = (-m) % _LANE
    if pad:
        assert p > 0, "zero-padding the feature dim requires p > 0"
        pred2d = jnp.pad(pred2d, ((0, 0), (0, pad)))
        targ2d = jnp.pad(targ2d, ((0, 0), (0, pad)))
    r = (m + pad) // _LANE

    pred3d = pred2d.reshape(n, r, _LANE)
    targ3d = targ2d.reshape(n, r, _LANE)

    # Pick the sublane extent S so each input block is ~block_bytes (multi-MiB
    # DMAs, near HBM roofline) while 2 inputs x 2 buffers stays well inside the
    # scoped VMEM limit on v5e/v6e/v7x. S must be a multiple of 8 (or == R).
    itemsize = max(jnp.dtype(pred3d.dtype).itemsize,
                   jnp.dtype(targ3d.dtype).itemsize)
    s_target = max(8, (block_bytes // (_LANE * itemsize)) // 8 * 8)
    if r <= s_target:
        s = r                      # full extent: always a legal block shape
        chunks = 1
        need_mask = False
    else:
        s = s_target
        chunks = pl.cdiv(r, s)
        need_mask = (r % s) != 0   # mask the ragged tail in-kernel (no big pad)

    kernel = functools.partial(
        _dice_kernel, smooth=float(smooth), p_pow=p,
        rows_per_block=s, total_rows=r, need_mask=need_mask)

    out = pl.pallas_call(
        kernel,
        out_shape=jax.ShapeDtypeStruct((n, 1, _LANE), jnp.float32),
        grid_spec=pltpu.PrefetchScalarGridSpec(
            num_scalar_prefetch=0,
            grid=(n, chunks),
            in_specs=[
                pl.BlockSpec((None, s, _LANE), lambda b, c: (b, c, 0)),
                pl.BlockSpec((None, s, _LANE), lambda b, c: (b, c, 0)),
            ],
            # Lane-dense per-sample output; written once on the last chunk.
            out_specs=pl.BlockSpec((1, 1, _LANE), lambda b, c: (b, 0, 0)),
            scratch_shapes=[
                pltpu.VMEM((1, _LANE), jnp.float32),  # per-lane num partials
                pltpu.VMEM((1, _LANE), jnp.float32),  # per-lane den partials
            ],
        ),
        compiler_params=pltpu.CompilerParams(
            # Batch axis parallel (engages both TCs on v7x); reduction last.
            dimension_semantics=("parallel", "arbitrary"),
            vmem_limit_bytes=48 * 1024 * 1024,
        ),
    )(pred3d, targ3d)

    # reduction='sum' over the batch (matches loss.sum() in the module).
    return jnp.sum(out[:, 0, 0])


def binary_dice_loss_ref(predict, target, *, smooth=1.0, p=2):
    n = predict.shape[0]
    pr = predict.reshape(n, -1).astype(jnp.float32)
    tg = target.reshape(n, -1).astype(jnp.float32)
    num = 2.0 * jnp.sum(pr * tg, axis=1) + smooth
    den = jnp.sum(pr ** p + tg ** p, axis=1) + smooth
    return jnp.sum(1.0 - num / den)


if __name__ == "__main__":
    key = jax.random.PRNGKey(0)
    k1, k2 = jax.random.split(key)
    # predict: sigmoid-like probabilities; target: binary mask — both [N, C, H, W]
    predict = jax.nn.sigmoid(jax.random.normal(k1, (2, 4, 16, 16), dtype=jnp.float32))
    target = (jax.random.uniform(k2, (2, 4, 16, 16)) > 0.5).astype(jnp.float32)

    loss = jax.block_until_ready(binary_dice_loss(predict, target, smooth=1.0, p=2))
    ref = jax.block_until_ready(binary_dice_loss_ref(predict, target, smooth=1.0, p=2))
    assert jnp.allclose(loss, ref, rtol=1e-5, atol=1e-5), (loss, ref)

    # A larger, ragged case (M not a multiple of the block rows) to exercise
    # the multi-chunk + in-kernel tail-mask path.
    k3, k4 = jax.random.split(k2)
    predict2 = jax.nn.sigmoid(jax.random.normal(k3, (2, 8, 72, 96), dtype=jnp.float32))
    target2 = (jax.random.uniform(k4, (2, 8, 72, 96)) > 0.5).astype(jnp.float32)
    loss2 = jax.block_until_ready(
        binary_dice_loss(predict2, target2, smooth=1.0, p=2, block_bytes=64 * 1024))
    ref2 = jax.block_until_ready(binary_dice_loss_ref(predict2, target2, smooth=1.0, p=2))
    assert jnp.allclose(loss2, ref2, rtol=1e-5, atol=1e-5), (loss2, ref2)

    print("KERNEL_OK")
</pallas_src>

<mosaic_0001>
module attributes {stable_mosaic.version = 11 : i64} {
  func.func @_dice_kernel(%arg0: i32, %arg1: i32, %arg2: memref<1x8x128xf32, #tpu.memory_space<vmem>>, %arg3: memref<1x8x128xf32, #tpu.memory_space<vmem>>, %arg4: memref<1x1x128xf32, #tpu.memory_space<vmem>>, %arg5: memref<1x128xf32, #tpu.memory_space<vmem>>, %arg6: memref<1x128xf32, #tpu.memory_space<vmem>>) attributes {dimension_semantics = [#tpu.dimension_semantics<parallel>, #tpu.dimension_semantics<arbitrary>], iteration_bounds = array<i64: 2, 1>, scalar_prefetch = 0 : i64, scratch_operands = 2 : i64, tpu.core_type = #tpu.core_type<tc>, window_params = [{transform_indices = @transform_0, window_bounds = array<i64: 1, 8, 128>}, {transform_indices = @transform_1, window_bounds = array<i64: 1, 8, 128>}, {transform_indices = @transform_2, window_bounds = array<i64: 1, 1, 128>}]} {
    %c0_i32 = arith.constant 0 : i32
    %0 = arith.cmpi eq, %arg1, %c0_i32 : i32
    %1 = arith.extui %0 : i1 to i32
    %c0_i32_0 = arith.constant 0 : i32
    %2 = arith.cmpi ne, %1, %c0_i32_0 : i32
    scf.if %2 {
      %cst_17 = arith.constant 0.000000e+00 : f32
      %24 = vector.broadcast %cst_17 : f32 to vector<1x128xf32>
      %c0_18 = arith.constant 0 : index
      %c0_19 = arith.constant 0 : index
      %25 = vector.load %arg5[%c0_18, %c0_19] : memref<1x128xf32, #tpu.memory_space<vmem>>, vector<1x128xf32>
      tpu.vector_store %arg5[%c0_18, %c0_19], %24 {strides = array<i32>} : memref<1x128xf32, #tpu.memory_space<vmem>>, vector<1x128xf32>,
      %cst_20 = arith.constant 0.000000e+00 : f32
      %26 = vector.broadcast %cst_20 : f32 to vector<1x128xf32>
      %c0_21 = arith.constant 0 : index
      %c0_22 = arith.constant 0 : index
      %27 = vector.load %arg6[%c0_21, %c0_22] : memref<1x128xf32, #tpu.memory_space<vmem>>, vector<1x128xf32>
      tpu.vector_store %arg6[%c0_21, %c0_22], %26 {strides = array<i32>} : memref<1x128xf32, #tpu.memory_space<vmem>>, vector<1x128xf32>,
    } else {
    }
    %c0 = arith.constant 0 : index
    %c0_1 = arith.constant 0 : index
    %c0_2 = arith.constant 0 : index
    %3 = vector.load %arg2[%c0, %c0_1, %c0_2] : memref<1x8x128xf32, #tpu.memory_space<vmem>>, vector<1x8x128xf32>
    %4 = vector.shape_cast %3 : vector<1x8x128xf32> to vector<8x128xf32>
    %c0_3 = arith.constant 0 : index
    %c0_4 = arith.constant 0 : index
    %c0_5 = arith.constant 0 : index
    %5 = vector.load %arg3[%c0_3, %c0_4, %c0_5] : memref<1x8x128xf32, #tpu.memory_space<vmem>>, vector<1x8x128xf32>
    %6 = vector.shape_cast %5 : vector<1x8x128xf32> to vector<8x128xf32>
    %c0_6 = arith.constant 0 : index
    %c0_7 = arith.constant 0 : index
    %7 = vector.load %arg5[%c0_6, %c0_7] : memref<1x128xf32, #tpu.memory_space<vmem>>, vector<1x128xf32>
    %8 = arith.mulf %4, %6 : vector<8x128xf32>
    %cst = arith.constant dense<0.000000e+00> : vector<128xf32>
    %9 = vector.multi_reduction <add>, %8, %cst [0] : vector<8x128xf32> to vector<128xf32>
    %10 = vector.shape_cast %9 : vector<128xf32> to vector<1x128xf32>
    %11 = arith.addf %7, %10 : vector<1x128xf32>
    %c0_8 = arith.constant 0 : index
    %c0_9 = arith.constant 0 : index
    %12 = vector.load %arg5[%c0_8, %c0_9] : memref<1x128xf32, #tpu.memory_space<vmem>>, vector<1x128xf32>
    tpu.vector_store %arg5[%c0_8, %c0_9], %11 {strides = array<i32>} : memref<1x128xf32, #tpu.memory_space<vmem>>, vector<1x128xf32>,
    %13 = arith.mulf %4, %4 : vector<8x128xf32>
    %14 = arith.mulf %6, %6 : vector<8x128xf32>
    %15 = arith.addf %13, %14 : vector<8x128xf32>
    %c0_10 = arith.constant 0 : index
    %c0_11 = arith.constant 0 : index
    %16 = vector.load %arg6[%c0_10, %c0_11] : memref<1x128xf32, #tpu.memory_space<vmem>>, vector<1x128xf32>
    %cst_12 = arith.constant dense<0.000000e+00> : vector<128xf32>
    %17 = vector.multi_reduction <add>, %15, %cst_12 [0] : vector<8x128xf32> to vector<128xf32>
    %18 = vector.shape_cast %17 : vector<128xf32> to vector<1x128xf32>
    %19 = arith.addf %16, %18 : vector<1x128xf32>
    %c0_13 = arith.constant 0 : index
    %c0_14 = arith.constant 0 : index
    %20 = vector.load %arg6[%c0_13, %c0_14] : memref<1x128xf32, #tpu.memory_space<vmem>>, vector<1x128xf32>
    tpu.vector_store %arg6[%c0_13, %c0_14], %19 {strides = array<i32>} : memref<1x128xf32, #tpu.memory_space<vmem>>, vector<1x128xf32>,
    %c0_i32_15 = arith.constant 0 : i32
    %21 = arith.cmpi eq, %arg1, %c0_i32_15 : i32
    %22 = arith.extui %21 : i1 to i32
    %c0_i32_16 = arith.constant 0 : i32
    %23 = arith.cmpi ne, %22, %c0_i32_16 : i32
    scf.if %23 {
      %c0_17 = arith.constant 0 : index
      %c0_18 = arith.constant 0 : index
      %24 = vector.load %arg5[%c0_17, %c0_18] : memref<1x128xf32, #tpu.memory_space<vmem>>, vector<1x128xf32>
      %25 = vector.shape_cast %24 : vector<1x128xf32> to vector<1x1x128xf32>
      %cst_19 = arith.constant dense<0.000000e+00> : vector<1xf32>
      %26 = vector.multi_reduction <add>, %25, %cst_19 [1, 2] : vector<1x1x128xf32> to vector<1xf32>
      %27 = vector.shape_cast %26 : vector<1xf32> to vector<1x1x1xf32>
      %28 = vector.extract %27[0, 0, 0] : f32 from vector<1x1x1xf32>
      %cst_20 = arith.constant 2.000000e+00 : f32
      %29 = arith.mulf %cst_20, %28 : f32
      %cst_21 = arith.constant 1.000000e+00 : f32
      %30 = arith.addf %29, %cst_21 : f32
      %c0_22 = arith.constant 0 : index
      %c0_23 = arith.constant 0 : index
      %31 = vector.load %arg6[%c0_22, %c0_23] : memref<1x128xf32, #tpu.memory_space<vmem>>, vector<1x128xf32>
      %32 = vector.shape_cast %31 : vector<1x128xf32> to vector<1x1x128xf32>
      %cst_24 = arith.constant dense<0.000000e+00> : vector<1xf32>
      %33 = vector.multi_reduction <add>, %32, %cst_24 [1, 2] : vector<1x1x128xf32> to vector<1xf32>
      %34 = vector.shape_cast %33 : vector<1xf32> to vector<1x1x1xf32>
      %35 = vector.extract %34[0, 0, 0] : f32 from vector<1x1x1xf32>
      %cst_25 = arith.constant 1.000000e+00 : f32
      %36 = arith.addf %35, %cst_25 : f32
      %37 = arith.divf %30, %36 : f32
      %cst_26 = arith.constant 1.000000e+00 : f32
      %38 = arith.subf %cst_26, %37 : f32
      %39 = vector.broadcast %38 : f32 to vector<1x1x128xf32>
      %c0_27 = arith.constant 0 : index
      %c0_28 = arith.constant 0 : index
      %c0_29 = arith.constant 0 : index
      %40 = vector.load %arg4[%c0_27, %c0_28, %c0_29] : memref<1x1x128xf32, #tpu.memory_space<vmem>>, vector<1x1x128xf32>
      tpu.vector_store %arg4[%c0_27, %c0_28, %c0_29], %39 {strides = array<i32>} : memref<1x1x128xf32, #tpu.memory_space<vmem>>, vector<1x1x128xf32>,
    } else {
    }
    return
  }
  func.func @transform_0(%arg0: i32, %arg1: i32) -> (i32, i32, i32) {
    %c0_i32 = arith.constant 0 : i32
    %c0_i32_0 = arith.constant 0 : i32
    return %arg0, %arg1, %c0_i32 : i32, i32, i32
  }
  func.func @transform_1(%arg0: i32, %arg1: i32) -> (i32, i32, i32) {
    %c0_i32 = arith.constant 0 : i32
    %c0_i32_0 = arith.constant 0 : i32
    return %arg0, %arg1, %c0_i32 : i32, i32, i32
  }
  func.func @transform_2(%arg0: i32, %arg1: i32) -> (i32, i32, i32) {
    %c0_i32 = arith.constant 0 : i32
    %c0_i32_0 = arith.constant 0 : i32
    %c0_i32_1 = arith.constant 0 : i32
    return %arg0, %c0_i32, %c0_i32_0 : i32, i32, i32
  }
}

</mosaic_0001>

<bundles_post_ra>
// kernel: tpu_custom_call.1
= control target key start
LH: loop header
LB: loop body
LE: loop exit
PB: predicated region body
PF: predicated region fallthrough
CT: control target
= control target key end

     0   :  { %7 = vsyncpa [#allocation5], 0  ;;  %s869_s0 = inlined_call_operand.hbm [shape: f32[2,8,128], index: 0, kind: input, shape index: {}]   ;;  %s870_s1 = inlined_call_operand.hbm [shape: f32[2,8,128], index: 1, kind: input, shape index: {}]   ;;  %s871_s2 = inlined_call_operand.hbm [shape: f32[2,1,128], index: 2, kind: output, shape index: {}]  }
   0x1   :  { %9 = vsyncpa [#allocation5 + $0x1], 0 }
   0x2   :  { %10 = vsyncpa [#allocation8], 0 }
   0x3   :  { %12 = vsyncpa [#allocation8 + $0x1], 0 }
   0x4   :  { %13 = vsyncpa [#allocation6], 0 }
   0x5   :  { %15 = vsyncpa [#allocation6 + $0x1], 0  ;;  %s648_s9 = smov 0   ;;  %s650_s10 = smov 0  }
   0x6   :  { %s652_s11 = smov 0   ;;  %s654_s12 = smov 0  }
   0x7   :  { %s656_s13 = smov 0   ;;  %s658_s14 = smov 0  }
   0x8 LB: > { %s391_s15 = sadd.s32 4294967295, %s627_s14   ;;  %s392_s16 = sadd.s32 4294967294, %s627_s14   ;;  %s627_s14 = sphi %s658_s14, %s21_s14   ;;  %s623_s13 = sphi %s656_s13, %s891_s13   ;;  %s619_s12 = sphi %s654_s12, %s890_s12   ;;  %s615_s11 = sphi %s652_s11, %s889_s11   ;;  %s611_s10 = sphi %s650_s10, %s888_s10   ;;  %s607_s9 = sphi %s648_s9, %s887_s9  }
   0x9   : > { %s33_s17 = sadd.s32 1, %s623_s13  ;;  %s42_s18 = sadd.s32 1, %s615_s11 }
   0xa   : > { %p35_p0 = scmp.ge.s32.totalorder %s33_s17, 2  ;;  %p49_p1 = scmp.ne.s32.totalorder %s615_s11, %s611_s10 }
   0xb   : > { %p50_p2 = scmp.eq.s32.totalorder %s627_s14, 0  ;;  %p55_p3 = scmp.ne.s32.totalorder %s611_s10, %s607_s9 }
   0xc   : > { %s893_s17 = smov (%p35_p0, %s33_s17), 0  ;;  %p56_p5 = scmp.eq.s32.totalorder %s391_s15, 0 }
   0xd   : > { %p689_p4 = por %p50_p2, %p49_p1  ;;  %s37_s20 = ssub.s32 %s623_s13, %s893_s17 }
   0xe   : > { %p107_p6 = scmp.eq.s32.totalorder %s391_s15, 1  ;;  %p40_p7 = scmp.eq.s32.totalorder %s37_s20, 0 }
   0xf   : > { %p695_p8 = por %p56_p5, %p55_p3  ;;  %p113_p10 = scmp.eq.s32.totalorder %s392_s16, 1 }
  0x10   : > { %p699_p9 = por %p107_p6, %p49_p1  ;;  %p428_p13 = scmp.lt.s32.totalorder %s627_s14, 2 }
  0x11   : > { %s875_s21 = scalar_select %p695_p8, 1, 0 }
  0x12   : > { %s876_s22 = scalar_select %p699_p9, 1, 0 }
  0x13   : > { %s704_s23 = scalar_select %p40_p7, %s615_s11, %s42_s18  }
  0x14   : > { %p706_p11 = por %p113_p10, %p55_p3  ;;  %s713_s25 = sand.u32 1, %s615_s11  }
  0x15   : > { %s395_s26 = sshll.u32 %s713_s25, 3  ;;  %s396_s27 = sshll.u32 %s623_s13, 7 }
  0x16   : > { %s877_s24 = scalar_select %p706_p11, 1, 0 }
  0x17   : > { %s722_s30 = scalar_lea.hbm %s869_s0, %s396_s27  ;;  %s137_s3 = scalar_lea.vmem [#allocation4], %s395_s26 }
  0x18   : > { %s145_s4 = sshll.u32 %s137_s3, 4  ;;  %p730_p0 = pnand %p428_p13, %p689_p4  ;;  %s726_s4 = int_to_ptr.vmem [resolvable:$true] %s145_s4 }
  0x19   : > { %s134_s6 = scalar_lea.sflag [#allocation5], %s713_s25  ;;  %s481_s7 = scalar_lea.hbm %s722_s30, 128 }
  0x1a   : > { %p482_p3 = scmp.ne.s32.totalorder %s722_s30, %s481_s7  ;;  %p483_p5 = pneg %p730_p0 }
  0x1b   : > { %s486_s16 = scalar_lea.hbm %s869_s0, 256  ;;  %p487_p4 = scmp.lt.u32.totalorder %s722_s30, %s869_s0 }
  0x1c   : > { %p484_p6 = pnand %p483_p5, %p482_p3  ;;  %p488_p10 = scmp.lt.u32.totalorder %s486_s16, %s481_s7 }
  0x1d   : > { %p490_p12 = scmp.lt.u32.totalorder %s481_s7, %s722_s30 }
  0x1e   : > { %p485_p7 = pneg %p484_p6  ;;  %p489_p13 = por %p488_p10, %p487_p4 }
  0x20   : > { %p491_p1 = por %p490_p12, %p489_p13 }
  0x22   : > { %p492_p2 = pnand %p491_p1, %p485_p7 }
  0x24   : > { %495 = shalt.err (!%p492_p2)
}
  0x25   : > { %s496_s20 = scalar_lea.vmem %s726_s4, 128  ;;  %s629_s28 = smov [#allocation4]  }
  0x26   : > { %p497_p3 = scmp.ne.s32.totalorder %s726_s4, %s496_s20  ;;  %s501_s29 = sshll.u32 %s629_s28, 4  ;;  %s502_s29 = int_to_ptr.vmem [resolvable:$false] %s501_s29 }
  0x27   : > { %s503_s3 = scalar_lea.vmem %s502_s29, 256  ;;  %p504_p9 = scmp.lt.s32.totalorder %s726_s4, %s502_s29 }
  0x28   : > { %p499_p6 = pnand %p497_p3, %p483_p5  ;;  %p505_p4 = scmp.lt.s32.totalorder %s503_s3, %s496_s20 }
  0x2a   : > { %p500_p11 = pneg %p499_p6  ;;  %p506_p10 = por %p505_p4, %p504_p9 }
  0x2c   : > { %p507_p12 = pnand %p506_p10, %p500_p11 }
  0x2e   : > { %510 = shalt.err (!%p507_p12)
}
  0x2f   : > { %420 = dma.hbm_to_vmem [thread:$0]  (!%p730_p0), %s722_s30, 128, %s726_s4, %s134_s6  }
  0x30   : > { %p879_p1 = scmp.lt.s32.totalorder %s627_s14, 3  ;;  %p880_p2 = scmp.ge.s32.totalorder %s627_s14, 1 }
  0x31   : > { %s775_s16 = scalar_lea.hbm %s870_s1, %s396_s27  ;;  %s156_s18 = scalar_lea.vmem [#allocation7], %s395_s26 }
  0x32   : > { %p766_p7 = pnand %p880_p2, %p879_p1  ;;  %s164_s19 = sshll.u32 %s156_s18, 4  ;;  %s165_s19 = int_to_ptr.vmem [resolvable:$true] %s164_s19 }
  0x33   : > { %s153_s30 = scalar_lea.sflag [#allocation8], %s713_s25  ;;  %s511_s4 = scalar_lea.hbm %s775_s16, 128 }
  0x34   : > { %s881_s7 = scalar_select %p766_p7, 1, 0 }
  0x35   : > { %p512_p9 = scmp.ne.s32.totalorder %s775_s16, %s511_s4  ;;  %s516_s27 = scalar_lea.hbm %s870_s1, 256 }
  0x36   : > { %p517_p3 = scmp.lt.u32.totalorder %s775_s16, %s870_s1  ;;  %p518_p6 = scmp.lt.u32.totalorder %s516_s27, %s511_s4 }
  0x37   : > { %p514_p11 = pnand %p512_p9, %p483_p5  ;;  %p520_p10 = scmp.lt.u32.totalorder %s511_s4, %s775_s16 }
  0x38   : > { %p519_p4 = por %p518_p6, %p517_p3 }
  0x39   : > { %p515_p13 = pneg %p514_p11 }
  0x3a   : > { %p521_p12 = por %p520_p10, %p519_p4 }
  0x3c   : > { %p522_p1 = pnand %p521_p12, %p515_p13 }
  0x3e   : > { %525 = shalt.err (!%p522_p1)
}
  0x3f   : > { %s526_s25 = scalar_lea.vmem %s165_s19, 128  ;;  %s630_s26 = smov [#allocation7]  }
  0x40   : > { %p527_p2 = scmp.ne.s32.totalorder %s165_s19, %s526_s25  ;;  %s531_s3 = sshll.u32 %s630_s26, 4  ;;  %s532_s3 = int_to_ptr.vmem [resolvable:$false] %s531_s3 }
  0x41   : > { %s533_s8 = scalar_lea.vmem %s532_s3, 256  ;;  %p534_p8 = scmp.lt.s32.totalorder %s165_s19, %s532_s3 }
  0x42   : > { %p529_p9 = pnand %p527_p2, %p483_p5  ;;  %p535_p7 = scmp.lt.s32.totalorder %s533_s8, %s526_s25 }
  0x44   : > { %p530_p11 = pneg %p529_p9  ;;  %p536_p3 = por %p535_p7, %p534_p8 }
  0x46   : > { %p537_p6 = pnand %p536_p3, %p530_p11 }
  0x48   : > { %540 = shalt.err (!%p537_p6)
}
  0x49   : > { %423 = dma.hbm_to_vmem [thread:$0]  (!%p730_p0), %s775_s16, 128, %s165_s19, %s153_s30  }
  0x4a   : > { %p882_p13 = scmp.ne.s32.totalorder %s881_s7, 0 }
  0x4b   : > { %s802_s15 = sand.u32 (!%p882_p13), 1, %s611_s10   ;;  %p883_p5 = scmp.ne.s32.totalorder (!%p882_p13), %s875_s21, 0 }
  0x4c   : > { %173 = sbr.rel (%p882_p13) target bundleno = 403 (0x193), region = 28  ;;  %s400_s18 = sshll.u32 (!%p882_p13), %s802_s15, 3 }
  0x4d   : > { %s176_s4 = scalar_lea.sflag (!%p882_p13), [#allocation5], %s802_s15  ;;  %s179_s6 = scalar_lea.vmem (!%p882_p13), [#allocation4], %s400_s18 }
  0x53   : > { %594 = dma.done.wait (%p883_p5), %s176_s4, 128  }
  0x54   : > { %596 = vsyncadd (%p883_p5), %s176_s4, 4294967168  ;;  %s185_s5 = scalar_lea.sflag [#allocation8], %s802_s15  ;;  %s188_s16 = scalar_lea.vmem [#allocation7], %s400_s18 }
  0x55   : > { %598 = dma.done.wait (%p883_p5), %s185_s5, 128  }
  0x56   : > { %600 = vsyncadd (%p883_p5), %s185_s5, 4294967168  ;;  %v631_v0 = vmov 0.0   ;;  %v219_v1 = vld [vmem:[%s179_s6] sm:$0xff]  ;;  %v220_v2 = vld [vmem:[%s188_s16] sm:$0xff]  ;;  %vm247_vm0 = vcmask 1040384   ;;  %s402_s28 = sshll.u32 %s619_s12, 4 }
  0x57   : > { %217 = vst [vmem:[#allocation2] sm:$0x1] %v631_v0  ;;  %218 = vst [vmem:[#allocation3] sm:$0x1] %v631_v0  ;;  %v222_v3 = vmul.f32 %v220_v2, %v219_v1  ;;  %v231_v4 = vmul.f32 %v219_v1, %v219_v1  ;;  %v232_v5 = vmul.f32 %v220_v2, %v220_v2  ;;  %s212_s25 = scalar_lea.vmem [#allocation9], %s802_s15  ;;  %s820_s4 = scalar_lea.hbm %s871_s2, %s402_s28 }
  0x58   : > { %s292_s26 = sshll.u32 %s212_s25, 4  ;;  %s280_s6 = scalar_lea.sflag [#allocation6], %s802_s15  ;;  %s822_s26 = int_to_ptr.vmem [resolvable:$true] %s292_s26 }
  0x59   : > { %v223_v6 = vrot.slane %v222_v3, 4  ;;  %v233_v7 = vadd.f32 %v232_v5, %v231_v4  ;;  %s541_s5 = scalar_lea.vmem %s822_s26, 16  ;;  %p884_p0 = scmp.ne.s32.totalorder %s876_s22, 0 }
  0x5a   : > { %p542_p8 = scmp.ne.s32.totalorder %s822_s26, %s541_s5  ;;  %s632_s12 = smov [#allocation9]  }
  0x5b   : > { %v224_v8 = vadd.f32 %v223_v6, %v222_v3  ;;  %v235_v9 = vrot.slane %v233_v7, 4  ;;  %s545_s16 = sshll.u32 %s632_s12, 4  ;;  %s546_s16 = int_to_ptr.vmem [resolvable:$false] %s545_s16 }
  0x5c   : > { %p543_p7 = pnand %p542_p8, %p884_p0  ;;  %p548_p10 = scmp.lt.s32.totalorder %s822_s26, %s546_s16 }
  0x5d   : > { %v225_v10 = vrot.slane %v224_v8, 2  ;;  %v236_v11 = vadd.f32 %v235_v9, %v233_v7 }
  0x5e   : > { %v221_v16 = vld [vmem:[#allocation2] sm:$0x1]  ;;  %v234_v19 = vld [vmem:[#allocation3] sm:$0x1]  ;;  %p544_p4 = pneg %p543_p7 }
  0x5f   : > { %v226_v12 = vadd.f32 %v225_v10, %v224_v8  ;;  %v237_v13 = vrot.slane %v236_v11, 2 }
  0x61   : > { %v227_v14 = vrot.slane %v226_v12, 1  ;;  %v238_v15 = vadd.f32 %v237_v13, %v236_v11 }
  0x63   : > { %v228_v17 = vadd.f32 %v227_v14, %v226_v12  ;;  %v239_v18 = vrot.slane %v238_v15, 1 }
  0x65   : > { %v229_v20 = vadd.f32 %v228_v17, %v221_v16  ;;  %v240_v21 = vadd.f32 %v239_v18, %v238_v15 }
  0x67   : > { %230 = vst [vmem:[#allocation2] sm:$0x1] %v229_v20  ;;  %v241_v22 = vadd.f32 %v240_v21, %v234_v19 }
  0x69   : > { %242 = vst [vmem:[#allocation3] sm:$0x1] %v241_v22 }
  0x6e   : > { %v246_v23 = vld [vmem:[#allocation2] sm:$0x1] }
  0x6f   : > { %v248_v24 = vsel %vm247_vm0, %v246_v23, 0.0 }
  0x70   : > { %249 = vadd.xlane.f32.xlu0 %v248_v24  ;;  %v260_v25 = vld [vmem:[#allocation3] sm:$0x1] }
  0x71   : > { %v261_v26 = vsel %vm247_vm0, %v260_v25, 0.0 }
  0x74   : > { %262 = vadd.xlane.f32.xlu0 %v261_v26 }
  0xfd   : > { %v250_v27 = vpop.xlane.xlu0 %249 }
  0xfe   : > { %v251_v28 = vrot.slane %v250_v27, 4 }
 0x100   : > { %v252_v29 = vadd.f32 %v251_v28, %v250_v27 }
 0x101   : > { %v263_v30 = vpop.xlane.xlu0 %262 }
 0x102   : > { %v253_v31 = vrot.slane %v252_v29, 2  ;;  %v264_v32 = vrot.slane %v263_v30, 4 }
 0x104   : > { %v265_v33 = vadd.f32 %v264_v32, %v263_v30  ;;  %v254_v34 = vadd.f32 %v253_v31, %v252_v29 }
 0x106   : > { %v266_v35 = vrot.slane %v265_v33, 2  ;;  %v255_v36 = vrot.slane %v254_v34, 1 }
 0x108   : > { %v267_v37 = vadd.f32 %v266_v35, %v265_v33  ;;  %v256_v38 = vadd.f32 %v255_v36, %v254_v34 }
 0x10a   : > { %405 = vpush %v256_v38  ;;  %v268_v39 = vrot.slane %v267_v37, 1 }
 0x10c   : > { %v269_v40 = vadd.f32 %v268_v39, %v267_v37 }
 0x10e   : > { %407 = vpush %v269_v40 }
 0x13b   : > { %s406_s21 = spop %405 }
 0x13c   : > { %s258_s30 = smul.f32 2.0, %s406_s21  ;;  %s547_s21 = scalar_lea.vmem %s546_s16, 32 }
 0x13d   : > { %p549_p12 = scmp.lt.s32.totalorder %s547_s21, %s541_s5 }
 0x13e   : > { %s259_s20 = sadd.f32 1.0, %s258_s30 }
 0x13f   : > { %s408_s7 = spop %407  ;;  %p550_p1 = por %p549_p12, %p548_p10 }
 0x140   : > { %s271_s19 = sadd.f32 1.0, %s408_s7 }
 0x141   : > { %p551_p2 = pnand %p550_p1, %p544_p4 }
 0x142   : > { %v272_v41 = vstv %s271_s19 }
 0x143   : > { %479 = vrcp.f32 %v272_v41 }
 0x14d   : > { %v480_v42 = vpop.eup %479 }
 0x14e   : > { %409 = vpush %v480_v42 }
 0x17f   : > { %s410_s27 = spop %409 }
 0x180   : > { %s275_s29 = smul.f32 %s410_s27, %s259_s20 }
 0x182   : > { %s276_s3 = ssub.f32 1.0, %s275_s29 }
 0x184   : > { %v277_v43 = vstv %s276_s3 }
 0x185   : > { %278 = vst [vmem:[%s212_s25] sm:$0x1] %v277_v43 }
 0x186   : > { %554 = shalt.err (!%p551_p2)
}
 0x187   : > { %s555_s15 = scalar_lea.hbm %s820_s4, 16  ;;  %s559_s30 = scalar_lea.hbm %s871_s2, 32 }
 0x188   : > { %p556_p9 = scmp.ne.s32.totalorder %s820_s4, %s555_s15  ;;  %p560_p6 = scmp.lt.u32.totalorder %s820_s4, %s871_s2 }
 0x189   : > { %p561_p13 = scmp.lt.u32.totalorder %s559_s30, %s555_s15  ;;  %p563_p8 = scmp.lt.u32.totalorder %s555_s15, %s820_s4 }
 0x18a   : > { %p557_p11 = pnand %p556_p9, %p884_p0 }
 0x18b   : > { %p562_p5 = por %p561_p13, %p560_p6 }
 0x18c   : > { %p558_p3 = pneg %p557_p11 }
 0x18d   : > { %p564_p7 = por %p563_p8, %p562_p5 }
 0x18f   : > { %p565_p4 = pnand %p564_p7, %p558_p3 }
 0x191   : > { %568 = shalt.err (!%p565_p4)
}
 0x192   : > { %415 = dma.vmem_to_hbm [thread:$0]  (%p884_p0), %s822_s26, 16, %s820_s4, %s280_s6  }
 0x193 PF: > { %s304_s28 = sand.u32 1, %s607_s9   ;;  %p885_p10 = scmp.ne.s32.totalorder %s877_s24, 0 }
 0x194   : > { %p886_p12 = scmp.ge.s32.totalorder %s627_s14, 2  ;;  %s305_s29 = scalar_lea.sflag [#allocation6], %s304_s28 }
 0x196   : > { %p425_p1 = pnand %p886_p12, %p885_p10 }
 0x198   : > { %602 = dma.done.wait (!%p425_p1), %s305_s29, 16  }
 0x199   : > { %604 = vsyncadd (!%p425_p1), %s305_s29, 4294967280  ;;  %s21_s14 = sadd.s32 1, %s627_s14   ;;  %s887_s9 = smov %s611_s10 }
 0x19a   : > { %p18_p2 = scmp.ge.s32.totalorder %s21_s14, 4   ;;  %s888_s10 = smov %s615_s11 }
 0x19b   : > { %s889_s11 = smov %s704_s23  ;;  %s890_s12 = smov %s623_s13 }
 0x19c   : > { %s891_s13 = smov %s893_s17  ;;  %20 = sbr.rel (!%p18_p2) target bundleno = 8 (0x8), region = 94 }
 0x1a3   :  { %309 = vsyncpa [#allocation5], 1 }
 0x1a4   :  { %311 = vsyncpa [#allocation5 + $0x1], 1 }
 0x1a5   :  { %312 = vsyncpa [#allocation8], 1 }
 0x1a6   :  { %314 = vsyncpa [#allocation8 + $0x1], 1 }
 0x1a7   :  { %315 = vsyncpa [#allocation6], 1 }
 0x1a8   :  { %317 = vsyncpa [#allocation6 + $0x1], 1 }

</bundles_post_ra>
